<compile_context>
chip_gen: v5e
topology: v5e:2x2
jax: 0.10.0
libtpu: 0.0.40
codegen_flags: <defaults>
</compile_context>

<pallas_src>
import functools
import math

import jax
import jax.numpy as jnp
import numpy as np
from jax.experimental import pallas as pl
from jax.experimental.pallas import tpu as pltpu


def _rope2d_kernel(x_ref, pos_ref, div_ref, o_ref, *, q: int, compute_dtype):
    """Quarter-wise RoPE-2D on one (TN, 4*q) tile. No lane-axis concatenates."""
    d = 2 * q

    div = div_ref[...]                              # (1, q) f32
    pos = pos_ref[...]                              # (TN, 2) f32 (pre-cast in wrapper)
    p0 = pos[:, 0:1]                                # (TN, 1)
    p1 = pos[:, 1:2]                                # (TN, 1)

    # ---- first half: columns [0, 2q), rotated by pos[..., 0] ----
    ang0 = p0 * div                                 # (TN, q) f32
    s0 = jnp.sin(ang0).astype(compute_dtype)
    c0 = jnp.cos(ang0).astype(compute_dtype)
    xa = x_ref[:, 0:q].astype(compute_dtype)
    xb = x_ref[:, q:d].astype(compute_dtype)
    o_ref[:, 0:q] = (xa * c0 - xb * s0).astype(o_ref.dtype)
    o_ref[:, q:d] = (xb * c0 + xa * s0).astype(o_ref.dtype)

    # ---- second half: columns [2q, 4q), rotated by pos[..., 1] ----
    ang1 = p1 * div
    s1 = jnp.sin(ang1).astype(compute_dtype)
    c1 = jnp.cos(ang1).astype(compute_dtype)
    xc = x_ref[:, d:d + q].astype(compute_dtype)
    xd = x_ref[:, d + q:2 * d].astype(compute_dtype)
    o_ref[:, d:d + q] = (xc * c1 - xd * s1).astype(o_ref.dtype)
    o_ref[:, d + q:2 * d] = (xd * c1 + xc * s1).astype(o_ref.dtype)


_DEFAULT_BUDGET_BYTES = 24 << 20   # double-buffered (x in + out) blocks, v7x-safe
_DEFAULT_LIMIT_BYTES = 32 << 20


def _vmem_budget():
    """(pipeline budget, vmem_limit_bytes), gated on physical VMEM size."""
    try:
        cap = getattr(pltpu.get_tpu_info(), "vmem_capacity_bytes", None)
    except Exception:
        cap = None
    if cap is not None and cap >= (128 << 20):     # v5e / v6e: 128 MiB VMEM
        return 48 << 20, 64 << 20
    return _DEFAULT_BUDGET_BYTES, _DEFAULT_LIMIT_BYTES   # v7x: 64 MiB per TC


def _round_up(v: int, m: int) -> int:
    return -(-v // m) * m


def _pick_tile_n(N: int, model_dim: int, itemsize: int, tile_n: int,
                 budget_bytes: int) -> int:
    """Largest row tile fitting the pipelined VMEM budget, sublane-aligned,
    with an even grid-step count (>=2) when possible for v7x core balance."""
    sub = max(8, 32 // max(1, itemsize))                 # 8 f32, 16 bf16, 32 i8/fp8
    # Double-buffered in + out blocks: 2 * (x_block + out_block) = 4*TN*D*itemsize.
    max_tn = budget_bytes // max(1, 4 * model_dim * itemsize)
    tn = max(sub, min(tile_n, max_tn))
    tn = max(sub, (tn // sub) * sub)
    if N <= tn:
        return int(max(sub, _round_up(N, sub)))
    g = -(-N // tn)
    if g % 2:  # even number of steps keeps v7x's two TensorCores balanced
        g += 1
        tn = max(sub, _round_up(-(-N // g), sub))
    return int(tn)


def rope2d(x, pos, *, temperature: float = 10000.0, tile_n: int = 2048):
    """x: (..., model_dim), pos: (..., 2). Returns same shape/dtype as x."""
    model_dim = x.shape[-1]
    assert model_dim % 4 == 0, "model_dim must be a multiple of 4"
    lead = x.shape[:-1]
    assert pos.shape == lead + (2,)

    d = model_dim // 2
    q = d // 2
    # div_term = exp(arange(0, d, 2) * -(log(temperature) / d)); passed as a
    # tiny (1, q) input so the kernel does not capture a traced constant.
    div_term = np.exp(
        np.arange(0, d, 2, dtype=np.float32) * -(math.log(temperature) / d)
    ).astype(np.float32)
    div = jnp.asarray(div_term).reshape(1, q)

    N = int(np.prod(lead)) if lead else 1
    xf = x.reshape(N, model_dim)
    pf = pos.reshape(N, 2).astype(jnp.float32)     # cast once, outside the kernel

    itemsize = int(np.dtype(x.dtype).itemsize)
    budget, vmem_limit = _vmem_budget()
    TN = _pick_tile_n(N, model_dim, itemsize, tile_n, budget)
    grid = pl.cdiv(N, TN)                           # no padding: Pallas clips tail block

    # bf16 inputs: do the multiply-adds in bf16 (2x VALU lanes on v6e/v7x);
    # angles + sin/cos stay f32. f32 inputs stay f32 (also the v5e-safe path).
    compute_dtype = jnp.bfloat16 if x.dtype == jnp.bfloat16 else jnp.float32

    kernel = functools.partial(_rope2d_kernel, q=q, compute_dtype=compute_dtype)

    cost = pl.CostEstimate(
        flops=6 * N * model_dim,
        transcendentals=N * model_dim,
        bytes_accessed=2 * N * model_dim * itemsize + 8 * N,
    )

    out = pl.pallas_call(
        kernel,
        out_shape=jax.ShapeDtypeStruct((N, model_dim), x.dtype),
        grid_spec=pltpu.PrefetchScalarGridSpec(
            num_scalar_prefetch=0,
            grid=(grid,),
            in_specs=[
                pl.BlockSpec((TN, model_dim), lambda i: (i, 0)),
                pl.BlockSpec((TN, 2), lambda i: (i, 0)),
                pl.BlockSpec((1, q), lambda i: (0, 0)),
            ],
            out_specs=pl.BlockSpec((TN, model_dim), lambda i: (i, 0)),
        ),
        compiler_params=pltpu.CompilerParams(
            dimension_semantics=("parallel",),
            vmem_limit_bytes=vmem_limit,
        ),
        cost_estimate=cost,
    )(xf, pf, div)

    return out.reshape(*lead, model_dim)


def rope2d_reference(x, pos, *, temperature: float = 10000.0):
    """Pure-JAX reference mirroring the PyTorch module."""
    D = x.shape[-1]
    d = D // 2
    q = d // 2
    div = jnp.exp(jnp.arange(0, d, 2, dtype=jnp.float32) * (-(math.log(temperature) / d)))

    def rope_half(xh, p):
        ang = p[..., None].astype(jnp.float32) * div
        s = jnp.concatenate([jnp.sin(ang), jnp.sin(ang)], axis=-1)
        c = jnp.concatenate([jnp.cos(ang), jnp.cos(ang)], axis=-1)
        rot = jnp.concatenate([-xh[..., q:], xh[..., :q]], axis=-1)
        return xh * c + rot * s

    x1 = rope_half(x[..., :d], pos[..., 0])
    x2 = rope_half(x[..., d:], pos[..., 1])
    return jnp.concatenate([x1, x2], axis=-1).astype(x.dtype)


if __name__ == "__main__":
    key = jax.random.PRNGKey(0)
    kx, kp = jax.random.split(key)

    batch, seq, model_dim = 2, 8, 32
    x = jax.random.normal(kx, (batch, seq, model_dim), dtype=jnp.float32)
    pos = jax.random.randint(kp, (batch, seq, 2), 0, 16, dtype=jnp.int32)

    out = rope2d(x, pos)
    out = jax.block_until_ready(out)

    ref = rope2d_reference(x, pos)
    np.testing.assert_allclose(np.asarray(out), np.asarray(ref), atol=1e-4, rtol=1e-4)

    print("KERNEL_OK")
</pallas_src>

<mosaic_0001>
module attributes {stable_mosaic.version = 11 : i64} {
  func.func @_rope2d_kernel(%arg0: i32, %arg1: memref<16x32xf32, #tpu.memory_space<vmem>>, %arg2: memref<16x2xf32, #tpu.memory_space<vmem>>, %arg3: memref<1x8xf32, #tpu.memory_space<vmem>>, %arg4: memref<16x32xf32, #tpu.memory_space<vmem>>) attributes {dimension_semantics = [#tpu.dimension_semantics<parallel>], iteration_bounds = array<i64: 1>, scalar_prefetch = 0 : i64, scratch_operands = 0 : i64, tpu.core_type = #tpu.core_type<tc>, window_params = [{transform_indices = @transform_0, window_bounds = array<i64: 16, 32>}, {transform_indices = @transform_1, window_bounds = array<i64: 16, 2>}, {pipeline_mode = #tpu.pipeline_mode<synchronous>, transform_indices = @transform_2, window_bounds = array<i64: 1, 8>}, {transform_indices = @transform_3, window_bounds = array<i64: 16, 32>}]} {
    %c0 = arith.constant 0 : index
    %c0_0 = arith.constant 0 : index
    %0 = vector.load %arg3[%c0, %c0_0] : memref<1x8xf32, #tpu.memory_space<vmem>>, vector<1x8xf32>
    %c0_1 = arith.constant 0 : index
    %c0_2 = arith.constant 0 : index
    %1 = vector.load %arg2[%c0_1, %c0_2] : memref<16x2xf32, #tpu.memory_space<vmem>>, vector<16x2xf32>
    %2 = vector.extract_strided_slice %1 {offsets = [0, 0], sizes = [16, 1], strides = [1, 1]} : vector<16x2xf32> to vector<16x1xf32>
    %3 = vector.extract_strided_slice %1 {offsets = [0, 1], sizes = [16, 1], strides = [1, 1]} : vector<16x2xf32> to vector<16x1xf32>
    %4 = vector.broadcast %2 : vector<16x1xf32> to vector<16x8xf32>
    %5 = vector.broadcast %0 : vector<1x8xf32> to vector<16x8xf32>
    %6 = arith.mulf %4, %5 : vector<16x8xf32>
    %7 = math.sin %6 : vector<16x8xf32>
    %8 = math.cos %6 : vector<16x8xf32>
    %c0_3 = arith.constant 0 : index
    %c0_4 = arith.constant 0 : index
    %9 = vector.load %arg1[%c0_3, %c0_4] : memref<16x32xf32, #tpu.memory_space<vmem>>, vector<16x8xf32>
    %c0_5 = arith.constant 0 : index
    %c8 = arith.constant 8 : index
    %10 = vector.load %arg1[%c0_5, %c8] : memref<16x32xf32, #tpu.memory_space<vmem>>, vector<16x8xf32>
    %11 = arith.mulf %9, %8 : vector<16x8xf32>
    %12 = arith.mulf %10, %7 : vector<16x8xf32>
    %13 = arith.subf %11, %12 : vector<16x8xf32>
    %c0_6 = arith.constant 0 : index
    %c0_7 = arith.constant 0 : index
    %14 = vector.load %arg4[%c0_6, %c0_7] : memref<16x32xf32, #tpu.memory_space<vmem>>, vector<16x8xf32>
    tpu.vector_store %arg4[%c0_6, %c0_7], %13 {strides = array<i32>} : memref<16x32xf32, #tpu.memory_space<vmem>>, vector<16x8xf32>,
    %15 = arith.mulf %10, %8 : vector<16x8xf32>
    %16 = arith.mulf %9, %7 : vector<16x8xf32>
    %17 = arith.addf %15, %16 : vector<16x8xf32>
    %c0_8 = arith.constant 0 : index
    %c8_9 = arith.constant 8 : index
    %18 = vector.load %arg4[%c0_8, %c8_9] : memref<16x32xf32, #tpu.memory_space<vmem>>, vector<16x8xf32>
    tpu.vector_store %arg4[%c0_8, %c8_9], %17 {strides = array<i32>} : memref<16x32xf32, #tpu.memory_space<vmem>>, vector<16x8xf32>,
    %19 = vector.broadcast %3 : vector<16x1xf32> to vector<16x8xf32>
    %20 = vector.broadcast %0 : vector<1x8xf32> to vector<16x8xf32>
    %21 = arith.mulf %19, %20 : vector<16x8xf32>
    %22 = math.sin %21 : vector<16x8xf32>
    %23 = math.cos %21 : vector<16x8xf32>
    %c0_10 = arith.constant 0 : index
    %c16 = arith.constant 16 : index
    %24 = vector.load %arg1[%c0_10, %c16] : memref<16x32xf32, #tpu.memory_space<vmem>>, vector<16x8xf32>
    %c0_11 = arith.constant 0 : index
    %c24 = arith.constant 24 : index
    %25 = vector.load %arg1[%c0_11, %c24] : memref<16x32xf32, #tpu.memory_space<vmem>>, vector<16x8xf32>
    %26 = arith.mulf %24, %23 : vector<16x8xf32>
    %27 = arith.mulf %25, %22 : vector<16x8xf32>
    %28 = arith.subf %26, %27 : vector<16x8xf32>
    %c0_12 = arith.constant 0 : index
    %c16_13 = arith.constant 16 : index
    %29 = vector.load %arg4[%c0_12, %c16_13] : memref<16x32xf32, #tpu.memory_space<vmem>>, vector<16x8xf32>
    tpu.vector_store %arg4[%c0_12, %c16_13], %28 {strides = array<i32>} : memref<16x32xf32, #tpu.memory_space<vmem>>, vector<16x8xf32>,
    %30 = arith.mulf %25, %23 : vector<16x8xf32>
    %31 = arith.mulf %24, %22 : vector<16x8xf32>
    %32 = arith.addf %30, %31 : vector<16x8xf32>
    %c0_14 = arith.constant 0 : index
    %c24_15 = arith.constant 24 : index
    %33 = vector.load %arg4[%c0_14, %c24_15] : memref<16x32xf32, #tpu.memory_space<vmem>>, vector<16x8xf32>
    tpu.vector_store %arg4[%c0_14, %c24_15], %32 {strides = array<i32>} : memref<16x32xf32, #tpu.memory_space<vmem>>, vector<16x8xf32>,
    return
  }
  func.func @transform_0(%arg0: i32) -> (i32, i32) {
    %c0_i32 = arith.constant 0 : i32
    %c0_i32_0 = arith.constant 0 : i32
    return %arg0, %c0_i32 : i32, i32
  }
  func.func @transform_1(%arg0: i32) -> (i32, i32) {
    %c0_i32 = arith.constant 0 : i32
    %c0_i32_0 = arith.constant 0 : i32
    return %arg0, %c0_i32 : i32, i32
  }
  func.func @transform_2(%arg0: i32) -> (i32, i32) {
    %c0_i32 = arith.constant 0 : i32
    %c0_i32_0 = arith.constant 0 : i32
    %c0_i32_1 = arith.constant 0 : i32
    return %c0_i32, %c0_i32_0 : i32, i32
  }
  func.func @transform_3(%arg0: i32) -> (i32, i32) {
    %c0_i32 = arith.constant 0 : i32
    %c0_i32_0 = arith.constant 0 : i32
    return %arg0, %c0_i32 : i32, i32
  }
}

</mosaic_0001>

<bundles_post_ra>
// kernel: tpu_custom_call.1
= control target key start
LH: loop header
LB: loop body
LE: loop exit
PB: predicated region body
PF: predicated region fallthrough
CT: control target
= control target key end

     0   :  { %v1481_v1 = vmov 1   ;;  %v1482_v2 = vmov 0   ;;  %s2139_s0 = inlined_call_operand.vmem [shape: f32[16,32], index: 0, kind: input, shape index: {}]   ;;  %s2140_s1 = inlined_call_operand.vmem [shape: f32[16,2], index: 1, kind: input, shape index: {}]   ;;  %s2141_s2 = inlined_call_operand.vmem [shape: f32[1,8], index: 2, kind: input, shape index: {}]   ;;  %s2142_s3 = inlined_call_operand.hbm [shape: f32[16,32], index: 3, kind: output, shape index: {}]  }
   0x1   :  { %v16_v0 = vld [vmem:[%s2140_s1] sm:$0xff]  ;;  %1452 = vset.pattern.permute.xlu1 %v1481_v1  ;;  %1451 = vset.pattern.permute.xlu0 %v1482_v2 }
   0x2   :  { %704 = vperm.xlu1 %1452, %v16_v0   ;;  %20 = vperm.xlu0 %1451, %v16_v0  }
   0x3   :  { %8 = vsyncpa [#allocation3], 0  ;;  %v17_v3 = vld [vmem:[%s2140_s1 + $0x8] sm:$0xff]  ;;  %v1454_v4 = vld [vmem:[%s2141_s2] ss:$0 sm:$0xff]  ;;  %s1489_s1 = smov 24  }
   0x4   :  { %v1483_v25 = vmov 2102212464   ;;  %v1484_v27 = vmov 920167782   ;;  %v1485_v30 = vmov 2131351028  }
   0x5   :  { %v1486_v34 = vmov 1326507024   ;;  %v1487_v37 = vmov 2475754826   ;;  %v1488_v43 = vmov 683565275  }
   0x6   :  { %s1490_s2 = smov 8   ;;  %s1491_s18 = smov 16  }
   0x7   :  { %s1492_s23 = smov 120   ;;  %s1401_s25 = sshll.u32 %s2142_s3, 4  ;;  %s1402_s25 = int_to_ptr.hbm [resolvable:$true] %s1401_s25 }
   0x8   :  { %s1493_s26 = smov [#allocation2]   ;;  %s1494_s28 = smov 128  }
   0x9   :  { %s1399_s27 = sshll.u32 %s1493_s26, 4  ;;  %s1400_s27 = int_to_ptr.vmem [resolvable:$true] %s1399_s27 }
   0xa   :  { %708 = vperm.xlu1 %1452, %v17_v3   ;;  %25 = vperm.xlu0 %1451, %v17_v3  }
  0x12   :  { %1453 = vset.pattern.permute.xlu0 %v1481_v1 }
  0x74   :  { %v705_v5 = vpop.permute.xlu1 %704  ;;  %v21_v6 = vpop.permute.xlu0 %20 }
  0x75   :  { %v1525_v7 = vmul.f32 %v1454_v4, %v705_v5  ;;  %v1527_v8 = vmul.f32 %v1454_v4, %v21_v6 }
  0x77   :  { %v716_v9 = vand.u32 2139095040, %v1525_v7  ;;  %v36_v10 = vand.u32 2139095040, %v1527_v8  ;;  %v2147_v17 = vand.u32 2147483647, %v1525_v7 }
  0x79   :  { %v717_v11 = vshrl.u32 %v716_v9, 23  ;;  %v37_v12 = vshrl.u32 %v36_v10, 23  ;;  %v720_v21 = vand.u32 8388607, %v2147_v17 }
  0x7b   :  { %v1425_v13 = vadd.s32 4294967169, %v717_v11  ;;  %v1413_v14 = vadd.s32 4294967169, %v37_v12  ;;  %v721_v36 = vor.u32 8388608, %v720_v21 }
  0x7c   :  { %v709_v20 = vpop.permute.xlu1 %708  ;;  %v26_v49 = vpop.permute.xlu0 %25 }
  0x7d   :  { %v723_v15 = vadd.s32 1, %v1425_v13  ;;  %v43_v16 = vadd.s32 1, %v1413_v14  ;;  %v1534_v23 = vmul.f32 %v1454_v4, %v709_v20  ;;  %v1549_v53 = vshll.u32 %v721_v36, 8 }
  0x7e   :  { %v1554_v55 = vmul.f32 %v1454_v4, %v26_v49 }
  0x7f   :  { %vm724_vm0 = vcmp.gt.s32.totalorder %v723_v15, 0  ;;  %vm44_vm1 = vcmp.gt.s32.totalorder %v43_v16, 0  ;;  %v871_v48 = vand.u32 2139095040, %v1534_v23  ;;  %v2144_v63 = vand.u32 2147483647, %v1534_v23 }
  0x80   :  { %v725_v18 = vsel %vm724_vm0, %v723_v15, 0  ;;  %v45_v29 = vsel %vm44_vm1, %v43_v16, 0  ;;  %v191_v9 = vand.u32 2139095040, %v1554_v55  ;;  %v762_v20 = vand.u32 65535, %v1549_v53 }
  0x81   :  { %v727_v19 = vand.u32 31, %v725_v18  ;;  %v726_v24 = vshrl.u32 %v725_v18, 5  ;;  %v1546_v45 = vand.u32 31, %v45_v29  ;;  %v872_v59 = vshrl.u32 %v871_v48, 23 }
  0x82   :  { %v1575_v14 = vshrl.u32 %v45_v29, 5  ;;  %v875_v15 = vand.u32 8388607, %v2144_v63 }
  0x83   :  { %v728_v22 = vsub.s32 32, %v727_v19  ;;  %v739_v26 = vshll.u32 %v1483_v25, %v727_v19  ;;  %v742_v28 = vshll.u32 %v1484_v27, %v727_v19  ;;  %v733_v39 = vshll.u32 %v1487_v37, %v727_v19 }
  0x84   :  { %v736_v40 = vshll.u32 %v1485_v30, %v727_v19  ;;  %v730_v44 = vshll.u32 %v1488_v43, %v727_v19  ;;  %vm748_vm2 = vcmp.lt.s32.totalorder %v726_v24, 4  ;;  %vm745_vm3 = vcmp.lt.s32.totalorder %v726_v24, 1 }
  0x85   :  { %v734_v31 = vshrl.u32 %v1485_v30, %v728_v22  ;;  %v737_v32 = vshrl.u32 %v1483_v25, %v728_v22  ;;  %v740_v33 = vshrl.u32 %v1484_v27, %v728_v22  ;;  %v743_v35 = vshrl.u32 %v1486_v34, %v728_v22 }
  0x86   :  { %v731_v38 = vshrl.u32 %v1487_v37, %v728_v22  ;;  %vm747_vm4 = vcmp.lt.s32.totalorder %v726_v24, 3  ;;  %v1552_v54 = vsub.s32 32, %v1546_v45  ;;  %v729_v60 = vshrl.u32 %v1488_v43, %v728_v22 }
  0x87   :  { %v741_v41 = vor.u32 %v740_v33, %v739_v26  ;;  %v744_v42 = vor.u32 %v743_v35, %v742_v28  ;;  %v735_v46 = vor.u32 %v734_v31, %v733_v39  ;;  %v738_v47 = vor.u32 %v737_v32, %v736_v40 }
  0x88   :  { %v732_v50 = vor.u32 %v731_v38, %v730_v44  ;;  %vm746_vm5 = vcmp.lt.s32.totalorder %v726_v24, 2  ;;  %v59_v0 = vshll.u32 %v1483_v25, %v1546_v45  ;;  %v62_v1 = vshll.u32 %v1484_v27, %v1546_v45 }
  0x89   :  { %v758_v51 = vsel %vm748_vm2, %v744_v42, 1326507024  ;;  %v754_v52 = vsel %vm748_vm2, %v741_v41, 920167782  ;;  %v750_v56 = vsel %vm748_vm2, %v738_v47, 2102212464  ;;  %v757_v57 = vsel %vm745_vm3, %v735_v46, %v738_v47 }
  0x8a   :  { %v759_v58 = vsel %vm747_vm4, %v741_v41, %v758_v51  ;;  %v753_v61 = vsel %vm745_vm3, %v732_v50, %v735_v46  ;;  %v755_v62 = vsel %vm747_vm4, %v738_v47, %v754_v52  ;;  %v1428_v3 = vadd.s32 4294967169, %v872_v59 }
  0x8b   :  { %v749_v4 = vsel %vm745_vm3, %v729_v60, %v732_v50  ;;  %v751_v5 = vsel %vm747_vm4, %v735_v46, %v750_v56  ;;  %v760_v6 = vsel %vm746_vm5, %v757_v57, %v759_v58  ;;  %v1569_v10 = vsel %vm746_vm5, %v753_v61, %v755_v62 }
  0x8c   :  { %v60_v11 = vshrl.u32 %v1484_v27, %v1552_v54  ;;  %v63_v12 = vshrl.u32 %v1486_v34, %v1552_v54  ;;  %v878_v13 = vadd.s32 1, %v1428_v3  ;;  %v1579_v16 = vsel %vm746_vm5, %v749_v4, %v751_v5 }
  0x8d   :  { %v765_v18 = vshrl.u32 %v760_v6, 16  ;;  %v192_v19 = vshrl.u32 %v191_v9, 23  ;;  %v764_v21 = vand.u32 65535, %v760_v6  ;;  %v787_v22 = vshrl.u32 %v1569_v10, 16 }
  0x8e   :  { %vm879_vm6 = vcmp.gt.s32.totalorder %v878_v13, 0  ;;  %v1584_v26 = vshrl.u32 %v1549_v53, 16  ;;  %v1586_v28 = vor.u32 %v60_v11, %v59_v0  ;;  %v64_v29 = vor.u32 %v63_v12, %v62_v1 }
  0x8f   :  { %v880_v24 = vsel %vm879_vm6, %v878_v13, 0  ;;  %v786_v32 = vand.u32 65535, %v1569_v10  ;;  %v806_v33 = vmul.u32 %v1549_v53, %v1579_v16  ;;  %vm68_vm7 = vcmp.lt.s32.totalorder %v1575_v14, 4 }
  0x90   :  { %v882_v31 = vand.u32 31, %v880_v24  ;;  %v2143_v35 = vand.u32 2147483647, %v1554_v55  ;;  %v1593_v36 = vmul.u32 %v765_v18, %v762_v20  ;;  %v876_v38 = vor.u32 8388608, %v875_v15 }
  0x91   :  { %v1416_v40 = vadd.s32 4294967169, %v192_v19  ;;  %v766_v41 = vmul.u32 %v764_v21, %v762_v20  ;;  %v769_v42 = vmul.u32 %v765_v18, %v1584_v26  ;;  %v1596_v44 = vmul.u32 %v787_v22, %v762_v20 }
  0x92   :  { %v883_v39 = vsub.s32 32, %v882_v31  ;;  %v1599_v46 = vmul.u32 %v787_v22, %v1584_v26  ;;  %v1604_v47 = vsel %vm68_vm7, %v1586_v28, 920167782  ;;  %v1608_v48 = vsel %vm68_vm7, %v64_v29, 1326507024 }
  0x93   :  { %v881_v49 = vshrl.u32 %v880_v24, 5  ;;  %v897_v56 = vshll.u32 %v1484_v27, %v882_v31  ;;  %v770_v58 = vshll.u32 %v1593_v36, 16  ;;  %v891_v59 = vshll.u32 %v1485_v30, %v882_v31 }
  0x94   :  { %v892_v50 = vshrl.u32 %v1483_v25, %v883_v39  ;;  %v889_v51 = vshrl.u32 %v1485_v30, %v883_v39  ;;  %v895_v52 = vshrl.u32 %v1484_v27, %v883_v39  ;;  %v898_v57 = vshrl.u32 %v1486_v34, %v883_v39 }
  0x95   :  { %v195_v60 = vand.u32 8388607, %v2143_v35  ;;  %v198_v61 = vadd.s32 1, %v1416_v40  ;;  %v886_v62 = vshrl.u32 %v1487_v37, %v883_v39  ;;  %v888_v0 = vshll.u32 %v1487_v37, %v882_v31 }
  0x96   :  { %v894_v1 = vshll.u32 %v1483_v25, %v882_v31  ;;  %v899_v3 = vor.u32 %v898_v57, %v897_v56  ;;  %v885_v4 = vshll.u32 %v1488_v43, %v882_v31  ;;  %v893_v5 = vor.u32 %v892_v50, %v891_v59 }
  0x97   :  { %v1623_v6 = vshll.u32 %v876_v38, 8  ;;  %v1626_v9 = vmul.u32 %v764_v21, %v1584_v26  ;;  %v890_v11 = vor.u32 %v889_v51, %v888_v0  ;;  %vm903_vm8 = vcmp.lt.s32.totalorder %v881_v49, 4 }
  0x98   :  { %v896_v12 = vor.u32 %v895_v52, %v894_v1  ;;  %vm199_vm9 = vcmp.gt.s32.totalorder %v198_v61, 0  ;;  %v913_v13 = vsel %vm903_vm8, %v899_v3, 1326507024  ;;  %v196_v15 = vor.u32 8388608, %v195_v60 }
  0x99   :  { %v200_v18 = vsel %vm199_vm9, %v198_v61, 0  ;;  %v771_v19 = vshrl.u32 %v1593_v36, 16  ;;  %vm774_vm10 = vc.u32 %v766_v41, %v770_v58  ;;  %v776_v22 = vadd.s32 %v770_v58, %v766_v41 }
  0x9a   :  { %v887_v24 = vor.u32 %v886_v62, %v885_v4  ;;  %v788_v29 = vmul.u32 %v786_v32, %v762_v20  ;;  %v884_v31 = vshrl.u32 %v1488_v43, %v883_v39  ;;  %vm900_vm11 = vcmp.lt.s32.totalorder %v881_v49, 1 }
  0x9b   :  { %vm902_vm12 = vcmp.lt.s32.totalorder %v881_v49, 3  ;;  %v905_v21 = vsel %vm903_vm8, %v893_v5, 2102212464  ;;  %v909_v38 = vsel %vm903_vm8, %v896_v12, 920167782  ;;  %v912_v40 = vsel %vm900_vm11, %v890_v11, %v893_v5 }
  0x9c   :  { %v914_v50 = vsel %vm902_vm12, %v896_v12, %v913_v13  ;;  %v202_v51 = vand.u32 31, %v200_v18  ;;  %v1633_v52 = vand.u32 65535, %v1623_v6  ;;  %v1636_v56 = vshrl.u32 %v1623_v6, 16 }
  0x9d   :  { %v1638_v41 = vshll.u32 %v196_v15, 8  ;;  %v775_v57 = vsel %vm774_vm10, 1, %v1482_v2  ;;  %vm901_vm13 = vcmp.lt.s32.totalorder %v881_v49, 2  ;;  %v904_v20 = vsel %vm900_vm11, %v884_v31, %v887_v24 }
  0x9e   :  { %v906_v39 = vsel %vm902_vm12, %v890_v11, %v905_v21  ;;  %v772_v58 = vshll.u32 %v1626_v9, 16  ;;  %v908_v59 = vsel %vm900_vm11, %v887_v24, %v890_v11  ;;  %v910_v60 = vsel %vm902_vm12, %v893_v5, %v909_v38 }
  0x9f   :  { %v1643_v61 = vsel %vm901_vm13, %v912_v40, %v914_v50  ;;  %v203_v62 = vsub.s32 32, %v202_v51  ;;  %v773_v0 = vshrl.u32 %v1626_v9, 16  ;;  %v777_v1 = vadd.s32 %v775_v57, %v769_v42 }
  0xa0   :  { %vm778_vm14 = vc.u32 %v776_v22, %v772_v58  ;;  %v1649_v3 = vmul.u32 %v786_v32, %v1584_v26  ;;  %v1652_v4 = vsel %vm901_vm13, %v904_v20, %v906_v39  ;;  %v1655_v12 = vand.u32 65535, %v1638_v41 }
  0xa1   :  { %v792_v5 = vshll.u32 %v1596_v44, 16  ;;  %v793_v11 = vshrl.u32 %v1596_v44, 16  ;;  %v1660_v13 = vsel %vm901_vm13, %v908_v59, %v910_v60  ;;  %v920_v42 = vshrl.u32 %v1643_v61, 16 }
  0xa2   :  { %v1663_v9 = vshrl.u32 %v200_v18, 5  ;;  %v208_v10 = vshll.u32 %v1487_v37, %v202_v51  ;;  %v211_v26 = vshll.u32 %v1485_v30, %v202_v51  ;;  %v217_v32 = vshll.u32 %v1484_v27, %v202_v51 }
  0xa3   :  { %v218_v15 = vshrl.u32 %v1486_v34, %v203_v62  ;;  %v779_v22 = vsel %vm778_vm14, 1, %v1482_v2  ;;  %v209_v24 = vshrl.u32 %v1485_v30, %v203_v62  ;;  %v212_v44 = vshrl.u32 %v1483_v25, %v203_v62 }
  0xa4   :  { %v214_v49 = vshll.u32 %v1483_v25, %v202_v51  ;;  %v215_v31 = vshrl.u32 %v1484_v27, %v203_v62  ;;  %v919_v18 = vand.u32 65535, %v1643_v61  ;;  %v941_v21 = vand.u32 65535, %v1660_v13 }
  0xa5   :  { %v1679_v40 = vshrl.u32 %v1638_v41, 16  ;;  %v942_v34 = vshrl.u32 %v1660_v13, 16  ;;  %vm220_vm15 = vcmp.lt.s32.totalorder %v1663_v9, 1  ;;  %vm222_vm0 = vcmp.lt.s32.totalorder %v1663_v9, 3 }
  0xa6   :  { %v781_v50 = vadd.s32 %v779_v22, %v777_v1  ;;  %v1685_v57 = vmul.u32 %v920_v42, %v1633_v52  ;;  %v205_v27 = vshll.u32 %v1488_v43, %v202_v51  ;;  %v206_v20 = vshrl.u32 %v1487_v37, %v203_v62 }
  0xa7   :  { %v219_v39 = vor.u32 %v218_v15, %v217_v32  ;;  %v1689_v58 = vor.u32 %v209_v24, %v208_v10  ;;  %v1691_v59 = vor.u32 %v212_v44, %v211_v26  ;;  %v216_v60 = vor.u32 %v215_v31, %v214_v49 }
  0xa8   :  { %vm223_vm1 = vcmp.lt.s32.totalorder %v1663_v9, 4  ;;  %v794_v35 = vshll.u32 %v1649_v3, 16  ;;  %vm796_vm2 = vc.u32 %v788_v29, %v792_v5  ;;  %v798_v63 = vadd.s32 %v792_v5, %v788_v29 }
  0xa9   :  { %v2145_v1 = vand.u32 2147483647, %v1527_v8  ;;  %v921_v51 = vmul.u32 %v919_v18, %v1633_v52  ;;  %v1700_v22 = vmul.u32 %v920_v42, %v1636_v56  ;;  %v1703_v10 = vmul.u32 %v942_v34, %v1633_v52 }
  0xaa   :  { %vm221_vm3 = vcmp.lt.s32.totalorder %v1663_v9, 2  ;;  %v782_v26 = vadd.s32 %v781_v50, %v771_v19  ;;  %v1709_v32 = vmul.u32 %v942_v34, %v1636_v56  ;;  %v233_v29 = vsel %vm223_vm1, %v219_v39, 1326507024 }
  0xab   :  { %v797_v5 = vsel %vm796_vm2, 1, %v1482_v2  ;;  %vm800_vm4 = vc.u32 %v798_v63, %v794_v35  ;;  %v925_v42 = vshll.u32 %v1685_v57, 16  ;;  %v204_v15 = vshrl.u32 %v1488_v43, %v203_v62 }
  0xac   :  { %v799_v24 = vadd.s32 %v797_v5, %v1599_v46  ;;  %v801_v44 = vsel %vm800_vm4, 1, %v1482_v2  ;;  %v207_v49 = vor.u32 %v206_v20, %v205_v27  ;;  %v229_v36 = vsel %vm223_vm1, %v216_v60, 920167782 }
  0xad   :  { %v232_v19 = vsel %vm220_vm15, %v1689_v58, %v1691_v59  ;;  %v40_v31 = vand.u32 8388607, %v2145_v1  ;;  %v234_v34 = vsel %vm222_vm0, %v216_v60, %v233_v29  ;;  %v1728_v62 = vadd.s32 %v782_v26, %v773_v0 }
  0xae   :  { %v795_v46 = vshrl.u32 %v1649_v3, 16  ;;  %v803_v50 = vadd.s32 %v801_v44, %v799_v24  ;;  %v50_v20 = vshll.u32 %v1488_v43, %v1546_v45  ;;  %v51_v39 = vshrl.u32 %v1487_v37, %v1552_v54 }
  0xaf   :  { %v41_v27 = vor.u32 8388608, %v40_v31  ;;  %v53_v5 = vshll.u32 %v1487_v37, %v1546_v45  ;;  %v54_v1 = vshrl.u32 %v1485_v30, %v1552_v54  ;;  %v56_v0 = vshll.u32 %v1485_v30, %v1546_v45 }
  0xb0   :  { %v804_v38 = vadd.s32 %v803_v50, %v793_v11  ;;  %v57_v3 = vshrl.u32 %v1483_v25, %v1552_v54  ;;  %v1743_v60 = vadd.s32 %v798_v63, %v794_v35  ;;  %v52_v26 = vor.u32 %v51_v39, %v50_v20 }
  0xb1   :  { %vm65_vm5 = vcmp.lt.s32.totalorder %v1575_v14, 1  ;;  %vm67_vm6 = vcmp.lt.s32.totalorder %v1575_v14, 3  ;;  %v1747_v24 = vor.u32 %v54_v1, %v53_v5  ;;  %vm66_vm8 = vcmp.lt.s32.totalorder %v1575_v14, 2 }
  0xb2   :  { %v805_v29 = vadd.s32 %v804_v38, %v795_v46  ;;  %v1749_v37 = vor.u32 %v57_v3, %v56_v0  ;;  %v228_v30 = vsel %vm220_vm15, %v207_v49, %v1689_v58  ;;  %vm808_vm9 = vc.u32 %v1728_v62, %v1743_v60 }
  0xb3   :  { %v79_v25 = vsel %vm67_vm6, %v1586_v28, %v1608_v48  ;;  %v1761_v45 = vshll.u32 %v41_v27, 8  ;;  %v230_v63 = vsel %vm222_vm0, %v1691_v59, %v229_v36  ;;  %v73_v11 = vsel %vm65_vm5, %v52_v26, %v1747_v24 }
  0xb4   :  { %v809_v35 = vadd.s32 1, %v805_v29  ;;  %v75_v38 = vsel %vm67_vm6, %v1749_v37, %v1604_v47  ;;  %v1775_v1 = vsel %vm221_vm3, %v232_v19, %v234_v34  ;;  %v77_v48 = vsel %vm65_vm5, %v1747_v24, %v1749_v37 }
  0xb5   :  { %v76_v28 = vsel %vm66_vm8, %v73_v11, %v75_v38  ;;  %v82_v44 = vand.u32 65535, %v1761_v45  ;;  %v1784_v36 = vadd.s32 %v925_v42, %v921_v51  ;;  %v80_v47 = vsel %vm66_vm8, %v77_v48, %v79_v25 }
  0xb6   :  { %v810_v31 = vsel %vm808_vm9, %v809_v35, %v805_v29  ;;  %v83_v46 = vshrl.u32 %v1761_v45, 16  ;;  %v84_v34 = vand.u32 65535, %v80_v47  ;;  %v85_v50 = vshrl.u32 %v80_v47, 16 }
  0xb7   :  { %v811_v19 = vadd.s32 %v810_v31, %v806_v33  ;;  %v106_v27 = vand.u32 65535, %v76_v28  ;;  %v1794_v20 = vsel %vm220_vm15, %v204_v15, %v207_v49  ;;  %v1798_v39 = vsel %vm221_vm3, %v228_v30, %v230_v63 }
  0xb8   :  { %v2146_v5 = vshrl.u32 %v1775_v1, 16  ;;  %v107_v0 = vshrl.u32 %v76_v28, 16  ;;  %vm1801_vm10 = vc.u32 %v921_v51, %v925_v42  ;;  %v86_v16 = vmul.u32 %v84_v34, %v82_v44 }
  0xb9   :  { %v812_v53 = vadd.s32 536870912, %v811_v19  ;;  %v87_v33 = vmul.u32 %v85_v50, %v82_v44  ;;  %v88_v29 = vmul.u32 %v84_v34, %v83_v46  ;;  %v49_v25 = vshrl.u32 %v1488_v43, %v1552_v54 }
  0xba   :  { %v108_v15 = vmul.u32 %v106_v27, %v82_v44  ;;  %v109_v49 = vmul.u32 %v107_v0, %v82_v44  ;;  %v110_v35 = vmul.u32 %v106_v27, %v83_v46  ;;  %v89_v30 = vmul.u32 %v85_v50, %v83_v46 }
  0xbb   :  { %v1807_v11 = vshrl.u32 %v812_v53, 30  ;;  %v90_v63 = vshll.u32 %v87_v33, 16  ;;  %v92_v38 = vshll.u32 %v88_v29, 16  ;;  %v1812_v51 = vsel %vm223_vm1, %v1691_v59, 2102212464 }
  0xbc   :  { %v239_v42 = vand.u32 65535, %v1775_v1  ;;  %v262_v28 = vshrl.u32 %v1798_v39, 16  ;;  %v112_v48 = vshll.u32 %v109_v49, 16  ;;  %v1819_v43 = vmul.u32 %v2146_v5, %v1655_v12 }
  0xbd   :  { %v814_v54 = vshll.u32 %v1807_v11, 30  ;;  %vm94_vm11 = vc.u32 %v86_v16, %v90_v63  ;;  %v96_v44 = vadd.s32 %v90_v63, %v86_v16  ;;  %v111_v47 = vmul.u32 %v107_v0, %v83_v46 }
  0xbe   :  { %v95_v31 = vsel %vm94_vm11, 1, %v1482_v2  ;;  %v114_v34 = vshll.u32 %v110_v35, 16  ;;  %vm116_vm12 = vc.u32 %v108_v15, %v112_v48  ;;  %v69_v50 = vsel %vm65_vm5, %v49_v25, %v52_v26 }
  0xbf   :  { %v1823_v59 = vsub.s32 %v811_v19, %v814_v54  ;;  %v97_v27 = vadd.s32 %v95_v31, %v89_v30  ;;  %vm98_vm13 = vc.u32 %v96_v44, %v92_v38  ;;  %v117_v5 = vsel %vm116_vm12, 1, %v1482_v2 }
  0xc0   :  { %v99_v53 = vsel %vm98_vm13, 1, %v1482_v2  ;;  %v118_v17 = vadd.s32 %v112_v48, %v108_v15  ;;  %v1832_v16 = vmul.u32 %v919_v18, %v1636_v56  ;;  %v91_v19 = vshrl.u32 %v87_v33, 16 }
  0xc1   :  { %vm816_vm14 = vcmp.lt.s32.totalorder %v1823_v59, 0  ;;  %v817_v46 = vsub.s32 0, %v1823_v59  ;;  %v101_v0 = vadd.s32 %v99_v53, %v97_v27  ;;  %v70_v26 = vsel %vm68_vm7, %v1749_v37, 2102212464 }
  0xc2   :  { %v93_v25 = vshrl.u32 %v88_v29, 16  ;;  %v119_v30 = vadd.s32 %v117_v5, %v111_v47  ;;  %vm120_vm15 = vc.u32 %v118_v17, %v114_v34  ;;  %v113_v38 = vshrl.u32 %v109_v49, 16 }
  0xc3   :  { %v818_v15 = vsel %vm816_vm14, %v817_v46, %v1823_v59  ;;  %v102_v63 = vadd.s32 %v101_v0, %v91_v19  ;;  %v121_v61 = vsel %vm120_vm15, 1, %v1482_v2  ;;  %v927_v54 = vshll.u32 %v1832_v16, 16 }
  0xc4   :  { %v819_v18 = vclz %v818_v15  ;;  %v123_v48 = vadd.s32 %v121_v61, %v119_v30  ;;  %v930_v33 = vsel %vm1801_vm10, 1, %v1482_v2  ;;  %v71_v37 = vsel %vm67_vm6, %v1747_v24, %v70_v26 }
  0xc5   :  { %v1848_v5 = vadd.s32 %v102_v63, %v93_v25  ;;  %v115_v29 = vshrl.u32 %v110_v35, 16  ;;  %v1850_v44 = vadd.s32 %v118_v17, %v114_v34  ;;  %v932_v47 = vadd.s32 %v930_v33, %v1700_v22 }
  0xc6   :  { %v1426_v49 = vadd.s32 4294967294, %v819_v18  ;;  %v124_v31 = vadd.s32 %v123_v48, %v113_v38  ;;  %vm933_vm7 = vc.u32 %v1784_v36, %v927_v54  ;;  %v241_v3 = vmul.u32 %v239_v42, %v1655_v12 }
  0xc7   :  { %v245_v27 = vshll.u32 %v1819_v43, 16  ;;  %v807_v24 = vadd.s32 %v1743_v60, %v1728_v62  ;;  %v934_v53 = vsel %vm933_vm7, 1, %v1482_v2  ;;  %v72_v17 = vsel %vm66_vm8, %v69_v50, %v71_v37 }
  0xc8   :  { %vm1427_vm1 = vcmp.lt.s32.totalorder %v1426_v49, 0  ;;  %v125_v35 = vadd.s32 %v124_v31, %v115_v29  ;;  %vm128_vm2 = vc.u32 %v1848_v5, %v1850_v44  ;;  %v943_v36 = vmul.u32 %v941_v21, %v1633_v52 }
  0xc9   :  { %v822_v22 = vsel %vm1427_vm1, 0, %v1426_v49  ;;  %v945_v34 = vmul.u32 %v941_v21, %v1636_v56  ;;  %v947_v62 = vshll.u32 %v1703_v10, 16  ;;  %v936_v14 = vadd.s32 %v934_v53, %v932_v47 }
  0xca   :  { %v823_v60 = vsub.s32 32, %v822_v22  ;;  %v827_v46 = vsub.s32 4294967266, %v822_v22  ;;  %v129_v19 = vadd.s32 1, %v125_v35  ;;  %v824_v50 = vshll.u32 %v1823_v59, %v822_v22 }
  0xcb   :  { %v126_v0 = vmul.u32 %v1761_v45, %v72_v17  ;;  %v926_v26 = vshrl.u32 %v1685_v57, 16  ;;  %vm951_vm4 = vc.u32 %v943_v36, %v947_v62  ;;  %vm715_vm5 = vcmp.lt.s32.totalorder %v1525_v7, 0 }
  0xcc   :  { %v825_v52 = vshrl.u32 %v807_v24, %v823_v60  ;;  %v828_v25 = vadd.s32 127, %v827_v46  ;;  %v130_v56 = vsel %vm128_vm2, %v129_v19, %v125_v35  ;;  %v952_v13 = vsel %vm951_vm4, 1, %v1482_v2 }
  0xcd   :  { %v131_v21 = vadd.s32 %v130_v56, %v126_v0  ;;  %v949_v30 = vshll.u32 %v945_v34, 16  ;;  %v953_v15 = vadd.s32 %v947_v62, %v943_v36  ;;  %v954_v59 = vadd.s32 %v952_v13, %v1709_v32 }
  0xce   :  { %v1884_v57 = vmul.u32 %v262_v28, %v1655_v12  ;;  %v826_v45 = vor.u32 %v825_v52, %v824_v50  ;;  %v829_v63 = vshll.u32 %v828_v25, 23  ;;  %v937_v38 = vadd.s32 %v936_v14, %v926_v26 }
  0xcf   :  { %vm1886_vm6 = vc.u32 %v241_v3, %v245_v27  ;;  %v2152_v18 = vand.u32 2147483647, %v1525_v7  ;;  %v132_v54 = vadd.s32 536870912, %v131_v21  ;;  %vm955_vm9 = vc.u32 %v953_v15, %v949_v30 }
  0xd0   :  { %v1899_v32 = vmul.u32 %v239_v42, %v1679_v40  ;;  %v251_v33 = vadd.s32 %v245_v27, %v241_v3  ;;  %v830_v37 = vor.u32 4788187, %v829_v63  ;;  %v928_v29 = vshrl.u32 %v1832_v16, 16 }
  0xd1   :  { %vm1892_vm8 = vcmp.le.f32.partialorder %v2152_v18, 0.7853982  ;;  %v956_v49 = vsel %vm955_vm9, 1, %v1482_v2  ;;  %v837_v31 = vsub.s32 4, %v1807_v11  ;;  %v1904_v47 = vshrl.u32 %v132_v54, 30 }
  0xd2   :  { %v948_v24 = vshrl.u32 %v1703_v10, 16  ;;  %v958_v53 = vadd.s32 %v956_v49, %v954_v59  ;;  %v831_v17 = vand.u32 2147483647, %v830_v37  ;;  %v833_v35 = vcvt.s32.f32 %v826_v45 }
  0xd3   :  { %v1907_v22 = vadd.s32 %v937_v38, %v928_v29  ;;  %v950_v36 = vshrl.u32 %v945_v34, 16  ;;  %v134_v42 = vshll.u32 %v1904_v47, 30  ;;  %v247_v27 = vshll.u32 %v1899_v32, 16 }
  0xd4   :  { %v959_v3 = vadd.s32 %v958_v53, %v948_v24  ;;  %v250_v16 = vsel %vm1886_vm6, 1, %v1482_v2  ;;  %v2155_v62 = vshrl.u32 %v1775_v1, 16  ;;  %v261_v10 = vand.u32 65535, %v1798_v39 }
  0xd5   :  { %v834_v46 = vmul.f32 %v833_v35, %v831_v17  ;;  %v1918_v19 = vadd.s32 %v953_v15, %v949_v30  ;;  %v838_v34 = vsel %vm715_vm5, %v837_v31, %v1807_v11  ;;  %v1923_v14 = vsub.s32 %v131_v21, %v134_v42 }
  0xd6   :  { %v244_v60 = vmul.u32 %v2155_v62, %v1679_v40  ;;  %v960_v50 = vadd.s32 %v959_v3, %v950_v36  ;;  %vm253_vm10 = vc.u32 %v251_v33, %v247_v27  ;;  %v226_v0 = vsel %vm222_vm0, %v1689_v58, %v1812_v51 }
  0xd7   :  { %v835_v1 = vxor.u32 2147483648, %v834_v46  ;;  %vm963_vm11 = vc.u32 %v1907_v22, %v1918_v19  ;;  %vm136_vm12 = vcmp.lt.s32.totalorder %v1923_v14, 0  ;;  %v137_v52 = vsub.s32 0, %v1923_v14 }
  0xd8   :  { %v252_v26 = vadd.s32 %v250_v16, %v244_v60  ;;  %v964_v25 = vadd.s32 1, %v960_v50  ;;  %v267_v11 = vshll.u32 %v1884_v57, 16  ;;  %v1938_v13 = vsel %vm1892_vm8, 0, %v838_v34 }
  0xd9   :  { %v836_v56 = vsel %vm715_vm5, %v835_v1, %v834_v46  ;;  %v254_v58 = vsel %vm253_vm10, 1, %v1482_v2  ;;  %v263_v51 = vmul.u32 %v261_v10, %v1655_v12  ;;  %v138_v30 = vsel %vm136_vm12, %v137_v52, %v1923_v14 }
  0xda   :  { %v839_v21 = vsel %vm1892_vm8, %v1525_v7, %v836_v56  ;;  %v965_v15 = vsel %vm963_vm11, %v964_v25, %v960_v50  ;;  %v265_v59 = vmul.u32 %v261_v10, %v1679_v40  ;;  %v1950_v45 = vsel %vm221_vm3, %v1794_v20, %v226_v0 }
  0xdb   :  { %v841_v63 = vmul.f32 %v839_v21, %v839_v21  ;;  %v139_v38 = vclz %v138_v30  ;;  %v2156_v61 = vmul.u32 %v1623_v6, %v1652_v4  ;;  %v266_v18 = vmul.u32 %v262_v28, %v1679_v40 }
  0xdc   :  { %v857_v48 = vadd.s32 3, %v1938_v13  ;;  %v256_v54 = vadd.s32 %v254_v58, %v252_v26  ;;  %vm271_vm0 = vc.u32 %v263_v51, %v267_v11  ;;  %v246_v20 = vshrl.u32 %v1819_v43, 16 }
  0xdd   :  { %v966_v12 = vadd.s32 %v965_v15, %v2156_v61  ;;  %v842_v33 = vmul.f32 -0.001358992, %v841_v63  ;;  %v849_v37 = vmul.f32 -0.00019511016, %v841_v63  ;;  %v1414_v29 = vadd.s32 4294967294, %v139_v38 }
  0xde   :  { %v269_v49 = vshll.u32 %v265_v59, 16  ;;  %v272_v31 = vsel %vm271_vm0, 1, %v1482_v2  ;;  %v273_v24 = vadd.s32 %v267_v11, %v263_v51  ;;  %v127_v40 = vadd.s32 %v1850_v44, %v1848_v5 }
  0xdf   :  { %v967_v9 = vadd.s32 536870912, %v966_v12  ;;  %v843_v6 = vadd.f32 0.041655596, %v842_v33  ;;  %v850_v4 = vadd.f32 0.008332121, %v849_v37  ;;  %vm1415_vm3 = vcmp.lt.s32.totalorder %v1414_v29, 0 }
  0xe0   :  { %v142_v39 = vsel %vm1415_vm3, 0, %v1414_v29  ;;  %v274_v28 = vadd.s32 %v272_v31, %v266_v18  ;;  %vm275_vm13 = vc.u32 %v273_v24, %v269_v49  ;;  %v257_v42 = vadd.s32 %v256_v54, %v246_v20 }
  0xe1   :  { %v1961_v53 = vshrl.u32 %v967_v9, 30  ;;  %v844_v17 = vmul.f32 %v843_v6, %v841_v63  ;;  %v851_v35 = vmul.f32 %v850_v4, %v841_v63  ;;  %v143_v36 = vsub.s32 32, %v142_v39 }
  0xe2   :  { %v147_v43 = vsub.s32 4294967266, %v142_v39  ;;  %v248_v27 = vshrl.u32 %v1899_v32, 16  ;;  %v276_v16 = vsel %vm275_vm13, 1, %v1482_v2  ;;  %v858_v34 = vand.u32 3, %v857_v48 }
  0xe3   :  { %v969_v3 = vshll.u32 %v1961_v53, 30  ;;  %v845_v62 = vadd.f32 -0.4999988, %v844_v17  ;;  %v852_v60 = vadd.f32 -0.16666654, %v851_v35  ;;  %v145_v10 = vshrl.u32 %v127_v40, %v143_v36 }
  0xe4   :  { %v278_v46 = vadd.s32 %v276_v16, %v274_v28  ;;  %v144_v5 = vshll.u32 %v1923_v14, %v142_v39  ;;  %v148_v44 = vadd.s32 127, %v147_v43  ;;  %v1969_v26 = vadd.s32 %v257_v42, %v248_v27 }
  0xe5   :  { %v970_v50 = vsub.s32 %v966_v12, %v969_v3  ;;  %v846_v0 = vmul.f32 %v845_v62, %v841_v63  ;;  %v853_v1 = vmul.f32 %v852_v60, %v841_v63  ;;  %v268_v52 = vshrl.u32 %v1884_v57, 16 }
  0xe6   :  { %vm856_vm14 = vweird.f32 %v1525_v7  ;;  %v146_v32 = vor.u32 %v145_v10, %v144_v5  ;;  %v149_v25 = vshll.u32 %v148_v44, 23  ;;  %v270_v58 = vshrl.u32 %v265_v59, 16 }
  0xe7   :  { %vm971_vm15 = vcmp.lt.s32.totalorder %v970_v50, 0  ;;  %v972_v2 = vsub.s32 0, %v970_v50  ;;  %v1973_v11 = vadd.f32 1.0, %v846_v0  ;;  %v854_v56 = vadd.f32 1.0, %v853_v1 }
  0xe8   :  { %v279_v51 = vadd.s32 %v278_v46, %v268_v52  ;;  %v281_v14 = vmul.u32 %v1638_v41, %v1950_v45  ;;  %v150_v30 = vor.u32 4788187, %v149_v25  ;;  %v1977_v63 = vadd.s32 %v273_v24, %v269_v49 }
  0xe9   :  { %v973_v15 = vsel %vm971_vm15, %v972_v2, %v970_v50  ;;  %v1979_v38 = vmul.f32 %v854_v56, %v839_v21  ;;  %v864_v57 = vxor.u32 2147483648, %v1973_v11  ;;  %vm35_vm7 = vcmp.lt.s32.totalorder %v1527_v8, 0 }
  0xea   :  { %v974_v61 = vclz %v973_v15  ;;  %v280_v12 = vadd.s32 %v279_v51, %v270_v58  ;;  %v151_v18 = vand.u32 2147483647, %v150_v30  ;;  %v153_v48 = vcvt.s32.f32 %v146_v32 }
  0xeb   :  { %vm283_vm1 = vc.u32 %v1969_v26, %v1977_v63  ;;  %vm859_vm2 = vcmp.lt.s32.totalorder %v858_v34, 2  ;;  %v861_v41 = vxor.u32 2147483648, %v1979_v38  ;;  %vm860_vm4 = vcmp.eq.s32.totalorder %v858_v34, 0 }
  0xec   :  { %v1429_v59 = vadd.s32 4294967294, %v974_v61  ;;  %v284_v45 = vadd.s32 1, %v280_v12  ;;  %vm863_vm5 = vcmp.eq.s32.totalorder %v858_v34, 2  ;;  %v154_v21 = vmul.f32 %v153_v48, %v151_v18 }
  0xed   :  { %v157_v54 = vsub.s32 4, %v1904_v47  ;;  %v862_v33 = vsel %vm860_vm4, %v1973_v11, %v861_v41  ;;  %v865_v37 = vsel %vm863_vm5, %v864_v57, %v1979_v38  ;;  %v962_v6 = vadd.s32 %v1918_v19, %v1907_v22 }
  0xee   :  { %vm1430_vm6 = vcmp.lt.s32.totalorder %v1429_v59, 0  ;;  %v285_v29 = vsel %vm283_vm1, %v284_v45, %v280_v12  ;;  %v866_v9 = vsel %vm859_vm2, %v862_v33, %v865_v37  ;;  %v155_v20 = vxor.u32 2147483648, %v154_v21 }
  0xef   :  { %v977_v49 = vsel %vm1430_vm6, 0, %v1429_v59  ;;  %v286_v31 = vadd.s32 %v285_v29, %v281_v14  ;;  %v1995_v24 = vsel %vm856_vm14, nan, %v866_v9  ;;  %v2157_v39 = vand.u32 2147483647, %v1527_v8 }
  0xf0   :  { %v978_v4 = vsub.s32 32, %v977_v49  ;;  %v982_v40 = vsub.s32 4294967266, %v977_v49  ;;  %1345 = vrot.lane.b32.xlu0 %v1995_v24, %s1489_s1  ;;  %v156_v28 = vsel %vm35_vm7, %v155_v20, %v154_v21  ;;  %v158_v17 = vsel %vm35_vm7, %v157_v54, %v1904_v47 }
  0xf1   :  { %vm34_vm8 = vcmp.le.f32.partialorder %v2157_v39, 0.7853982  ;;  %v287_v35 = vadd.s32 536870912, %v286_v31  ;;  %v979_v22 = vshll.u32 %v970_v50, %v977_v49  ;;  %vm870_vm10 = vcmp.lt.s32.totalorder %v1534_v23, 0 }
  0xf2   :  { %v159_v36 = vsel %vm34_vm8, %v1527_v8, %v156_v28  ;;  %v980_v19 = vshrl.u32 %v962_v6, %v978_v4  ;;  %v983_v42 = vadd.s32 127, %v982_v40  ;;  %v2011_v62 = vsel %vm34_vm8, 0, %v158_v17 }
  0xf3   :  { %v161_v43 = vmul.f32 %v159_v36, %v159_v36  ;;  %v2009_v3 = vshrl.u32 %v287_v35, 30  ;;  %v177_v0 = vadd.s32 3, %v2011_v62  ;;  %v992_v18 = vsub.s32 4, %v1961_v53 }
  0xf4   :  { %v981_v27 = vor.u32 %v980_v19, %v979_v22  ;;  %v984_v16 = vshll.u32 %v983_v42, 23  ;;  %v2158_v48 = vand.u32 2147483647, %v1534_v23  ;;  %v282_v40 = vadd.s32 %v1977_v63, %v1969_v26 }
  0xf5   :  { %v162_v60 = vmul.f32 -0.001358992, %v161_v43  ;;  %v169_v10 = vmul.f32 -0.00019511016, %v161_v43  ;;  %v289_v46 = vshll.u32 %v2009_v3, 30  ;;  %v178_v14 = vand.u32 3, %v177_v0 }
  0xf6   :  { %v985_v34 = vor.u32 4788187, %v984_v16  ;;  %v988_v1 = vcvt.s32.f32 %v981_v27  ;;  %vm2019_vm11 = vcmp.le.f32.partialorder %v2158_v48, 0.7853982  ;;  %v993_v49 = vsel %vm870_vm10, %v992_v18, %v1961_v53 }
  0xf7   :  { %v163_v5 = vadd.f32 0.041655596, %v162_v60  ;;  %v170_v47 = vadd.f32 0.008332121, %v169_v10  ;;  %v290_v44 = vsub.s32 %v286_v31, %v289_v46  ;;  %vm179_vm12 = vcmp.lt.s32.totalorder %v178_v14, 2 }
  0xf8   :  { %v986_v50 = vand.u32 2147483647, %v985_v34  ;;  %vm180_vm3 = vcmp.eq.s32.totalorder %v178_v14, 0  ;;  %vm183_vm13 = vcmp.eq.s32.totalorder %v178_v14, 2  ;;  %v995_v35 = vsel %vm2019_vm11, 0, %v993_v49 }
  0xf9   :  { %v164_v52 = vmul.f32 %v163_v5, %v161_v43  ;;  %v171_v32 = vmul.f32 %v170_v47, %v161_v43  ;;  %vm291_vm9 = vcmp.lt.s32.totalorder %v290_v44, 0  ;;  %v292_v25 = vsub.s32 0, %v290_v44 }
  0xfa   :  { %v989_v2 = vmul.f32 %v988_v1, %v986_v50  ;;  %vm176_vm15 = vweird.f32 %v1527_v8  ;;  %v1012_v47 = vadd.s32 3, %v995_v35  ;;  %vm190_vm7 = vcmp.lt.s32.totalorder %v1554_v55, 0 }
  0xfb   :  { %v165_v56 = vadd.f32 -0.4999988, %v164_v52  ;;  %v172_v58 = vadd.f32 -0.16666654, %v171_v32  ;;  %v293_v51 = vsel %vm291_vm9, %v292_v25, %v290_v44  ;;  %v312_v48 = vsub.s32 4, %v2009_v3 }
  0xfc   :  { %v990_v30 = vxor.u32 2147483648, %v989_v2  ;;  %v294_v15 = vclz %v293_v51  ;;  %v487_v59 = vand.u32 3, %v2011_v62  ;;  %vm1011_vm6 = vweird.f32 %v1534_v23 }
  0xfd   :  { %v166_v61 = vmul.f32 %v165_v56, %v161_v43  ;;  %v173_v12 = vmul.f32 %v172_v58, %v161_v43  ;;  %v313_v62 = vsel %vm190_vm7, %v312_v48, %v2009_v3 }
  0xfe   :  { %v991_v45 = vsel %vm870_vm10, %v990_v30, %v989_v2  ;;  %v1417_v21 = vadd.s32 4294967294, %v294_v15  ;;  %v1013_v2 = vand.u32 3, %v1012_v47  ;;  %v2161_v15 = vand.u32 2147483647, %v1554_v55 }
  0xff   :  { %v2023_v54 = vadd.f32 1.0, %v166_v61  ;;  %v174_v33 = vadd.f32 1.0, %v173_v12  ;;  %v994_v37 = vsel %vm2019_vm11, %v1534_v23, %v991_v45  ;;  %v1321_v12 = vand.u32 3, %v995_v35 }
 0x100   :  { %v996_v29 = vmul.f32 %v994_v37, %v994_v37  ;;  %vm1418_vm0 = vcmp.lt.s32.totalorder %v1417_v21, 0  ;;  %vm1015_vm1 = vcmp.eq.s32.totalorder %v1013_v2, 0  ;;  %vm2054_vm2 = vcmp.le.f32.partialorder %v2161_v15, 0.7853982 }
 0x101   :  { %v2028_v9 = vmul.f32 %v174_v33, %v159_v36  ;;  %v184_v20 = vxor.u32 2147483648, %v2023_v54  ;;  %v297_v31 = vsel %vm1418_vm0, 0, %v1417_v21  ;;  %vm1018_vm4 = vcmp.eq.s32.totalorder %v1013_v2, 2 }
 0x102   :  { %v997_v6 = vmul.f32 -0.001358992, %v996_v29  ;;  %v1004_v4 = vmul.f32 -0.00019511016, %v996_v29  ;;  %v298_v39 = vsub.s32 32, %v297_v31  ;;  %v302_v17 = vsub.s32 4294967266, %v297_v31 }
 0x103   :  { %v181_v28 = vxor.u32 2147483648, %v2028_v9  ;;  %v185_v26 = vsel %vm183_vm13, %v184_v20, %v2028_v9  ;;  %v299_v63 = vshll.u32 %v290_v44, %v297_v31  ;;  %vm1014_vm5 = vcmp.lt.s32.totalorder %v1013_v2, 2 }
 0x104   :  { %v998_v36 = vadd.f32 0.041655596, %v997_v6  ;;  %v1005_v22 = vadd.f32 0.008332121, %v1004_v4  ;;  %v300_v19 = vshrl.u32 %v282_v40, %v298_v39  ;;  %v303_v42 = vadd.s32 127, %v302_v17 }
 0x105   :  { %v182_v53 = vsel %vm180_vm3, %v2023_v54, %v181_v28  ;;  %vm1323_vm8 = vcmp.eq.s32.totalorder %v1321_v12, 0  ;;  %vm489_vm9 = vcmp.eq.s32.totalorder %v487_v59, 0  ;;  %vm1322_vm10 = vcmp.lt.s32.totalorder %v1321_v12, 2 }
 0x106   :  { %v186_v43 = vsel %vm179_vm12, %v182_v53, %v185_v26  ;;  %v999_v27 = vmul.f32 %v998_v36, %v996_v29  ;;  %v1006_v16 = vmul.f32 %v1005_v22, %v996_v29  ;;  %v301_v10 = vor.u32 %v300_v19, %v299_v63 }
 0x107   :  { %v2047_v60 = vsel %vm176_vm15, nan, %v186_v43  ;;  %v304_v46 = vshll.u32 %v303_v42, 23  ;;  %v491_v40 = vsel %vm489_vm9, %v2023_v54, %v181_v28  ;;  %v1167_v39 = vand.u32 3, %v1938_v13 }
 0x108   :  { %657 = vrot.lane.b32.xlu2 %v2047_v60, %s1490_s2  ;;  %v1000_v34 = vadd.f32 -0.4999988, %v999_v27  ;;  %v1007_v5 = vadd.f32 -0.16666654, %v1006_v16  ;;  %v308_v52 = vcvt.s32.f32 %v301_v10  ;;  %vm1326_vm11 = vcmp.eq.s32.totalorder %v1321_v12, 2 }
 0x109   :  { %v305_v44 = vor.u32 4788187, %v304_v46  ;;  %vm492_vm12 = vcmp.eq.s32.totalorder %v487_v59, 2  ;;  %v315_v36 = vsel %vm2054_vm2, 0, %v313_v62  ;;  %vm488_vm0 = vcmp.lt.s32.totalorder %v487_v59, 2 }
 0x10a   :  { %v1001_v0 = vmul.f32 %v1000_v34, %v996_v29  ;;  %v1008_v50 = vmul.f32 %v1007_v5, %v996_v29  ;;  %v494_v3 = vsel %vm492_vm12, %v184_v20, %v2028_v9  ;;  %v332_v13 = vadd.s32 3, %v315_v36 }
 0x10b   :  { %v306_v1 = vand.u32 2147483647, %v305_v44  ;;  %v495_v63 = vsel %vm488_vm0, %v491_v40, %v494_v3  ;;  %vm1169_vm3 = vcmp.eq.s32.totalorder %v1167_v39, 0  ;;  %vm1172_vm13 = vcmp.eq.s32.totalorder %v1167_v39, 2 }
 0x10c   :  { %v1002_v32 = vadd.f32 1.0, %v1001_v0  ;;  %v1009_v25 = vadd.f32 1.0, %v1008_v50  ;;  %v2086_v27 = vsel %vm176_vm15, nan, %v495_v63  ;;  %v1171_v54 = vsel %vm1169_vm3, %v1973_v11, %v861_v41 }
 0x10d   :  { %v309_v56 = vmul.f32 %v308_v52, %v306_v1  ;;  %v333_v23 = vand.u32 3, %v332_v13  ;;  %v1174_v8 = vsel %vm1172_vm13, %v864_v57, %v1979_v38  ;;  %v2105_v57 = vld [vmem:[%s2139_s0] sm:$0xff]  ;;  %v641_v50 = vand.u32 3, %v315_v36 }
 0x10e   :  { %v1010_v58 = vmul.f32 %v1009_v25, %v994_v37  ;;  %v1019_v51 = vxor.u32 2147483648, %v1002_v32  ;;  %v688_v7 = vmul.f32 %v2105_v57, %v2047_v60  ;;  %v652_v60 = vld [vmem:[%s2139_s0 + $0x8] sm:$0xff]  ;;  %vm700_vm9 = vcmask 130112  }
 0x10f   :  { %v310_v14 = vxor.u32 2147483648, %v309_v56  ;;  %vm335_vm15 = vcmp.eq.s32.totalorder %v333_v23, 0 }
 0x110   :  { %v1016_v30 = vxor.u32 2147483648, %v1010_v58  ;;  %v1020_v21 = vsel %vm1018_vm4, %v1019_v51, %v1010_v58  ;;  %v1328_v22 = vsel %vm1326_vm11, %v1019_v51, %v1010_v58  ;;  %vm331_vm4 = vweird.f32 %v1554_v55 }
 0x111   :  { %v311_v18 = vsel %vm190_vm7, %v310_v14, %v309_v56  ;;  %vm1168_vm7 = vcmp.lt.s32.totalorder %v1167_v39, 2  ;;  %vm1392_vm11 = vcmask 261312  }
 0x112   :  { %v1017_v45 = vsel %vm1015_vm1, %v1002_v32, %v1016_v30  ;;  %v314_v33 = vsel %vm2054_vm2, %v1554_v55, %v311_v18  ;;  %v1325_v4 = vsel %vm1323_vm8, %v1002_v32, %v1016_v30  ;;  %v1175_v5 = vsel %vm1168_vm7, %v1171_v54, %v1174_v8 }
 0x113   :  { %v1021_v37 = vsel %vm1014_vm5, %v1017_v45, %v1020_v21  ;;  %v316_v29 = vmul.f32 %v314_v33, %v314_v33  ;;  %v1329_v26 = vsel %vm1322_vm10, %v1325_v4, %v1328_v22  ;;  %vm338_vm1 = vcmp.eq.s32.totalorder %v333_v23, 2 }
 0x114   :  { %v1022_v49 = vsel %vm1011_vm6, nan, %v1021_v37  ;;  %v1330_v43 = vsel %vm1011_vm6, nan, %v1329_v26  ;;  %v1176_v44 = vsel %vm856_vm14, nan, %v1175_v5  ;;  %vm334_vm2 = vcmp.lt.s32.totalorder %v333_v23, 2 }
 0x115   :  { %1347 = vrot.lane.b32.xlu1 %v1022_v49, %s1489_s1  ;;  %1376 = vrot.lane.b32.xlu0 %v1022_v49, %s1491_s18  ;;  %v317_v31 = vmul.f32 -0.001358992, %v316_v29  ;;  %v324_v6 = vmul.f32 -0.00019511016, %v316_v29  ;;  %vm643_vm14 = vcmp.eq.s32.totalorder %v641_v50, 0  ;;  %vm646_vm5 = vcmp.eq.s32.totalorder %v641_v50, 2 }
 0x116   :  { %vm642_vm6 = vcmp.lt.s32.totalorder %v641_v50, 2  ;;  %vm675_vm8 = vcmask 64512   ;;  %vm1363_vm10 = vcmask 195712  }
 0x117   :  { %v318_v17 = vadd.f32 0.041655596, %v317_v31  ;;  %v325_v35 = vadd.f32 0.008332121, %v324_v6  ;;  %v653_v31 = vmul.f32 %v2105_v57, %v2086_v27 }
 0x119   :  { %v319_v19 = vmul.f32 %v318_v17, %v316_v29  ;;  %v326_v53 = vmul.f32 %v325_v35, %v316_v29 }
 0x11b   :  { %v320_v28 = vadd.f32 -0.4999988, %v319_v19  ;;  %v327_v42 = vadd.f32 -0.16666654, %v326_v53 }
 0x11d   :  { %v321_v16 = vmul.f32 %v320_v28, %v316_v29  ;;  %v328_v10 = vmul.f32 %v327_v42, %v316_v29  ;;  %1337 = vrot.lane.b32.xlu0 %v1330_v43, %s1491_s18  ;;  %680 = vrot.lane.b32.xlu1 %v2086_v27, %s1490_s2 }
 0x11f   :  { %v322_v9 = vadd.f32 1.0, %v321_v16  ;;  %v329_v20 = vadd.f32 1.0, %v328_v10 }
 0x121   :  { %v330_v46 = vmul.f32 %v329_v20, %v314_v33  ;;  %v339_v34 = vxor.u32 2147483648, %v322_v9 }
 0x123   :  { %v336_v47 = vxor.u32 2147483648, %v330_v46  ;;  %v340_v0 = vsel %vm338_vm1, %v339_v34, %v330_v46  ;;  %v648_v1 = vsel %vm646_vm5, %v339_v34, %v330_v46 }
 0x125   :  { %v337_v41 = vsel %vm335_vm15, %v322_v9, %v336_v47  ;;  %1366 = vrot.lane.b32.xlu0 %v1176_v44, %s1489_s1  ;;  %1368 = vrot.lane.b32.xlu1 %v1330_v43, %s1489_s1  ;;  %v645_v55 = vsel %vm643_vm14, %v322_v9, %v336_v47 }
 0x126   :  { %v341_v11 = vsel %vm334_vm2, %v337_v41, %v340_v0  ;;  %v649_v52 = vsel %vm642_vm6, %v645_v55, %v648_v1 }
 0x127   :  { %v342_v38 = vsel %vm331_vm4, nan, %v341_v11  ;;  %v650_v32 = vsel %vm331_vm4, nan, %v649_v52 }
 0x128   :  { %659 = vrot.lane.b32.xlu2 %v342_v38, %s1490_s2  ;;  %v689_v25 = vmul.f32 %v652_v60, %v342_v38  ;;  %v654_v22 = vmul.f32 %v652_v60, %v650_v32 }
 0x12d   :  { %692 = vrot.lane.b32.xlu1 %v688_v7, %s1490_s2 }
 0x130   :  { %1374 = vrot.lane.b32.xlu2 %v1995_v24, %s1491_s18 }
 0x138   :  { %682 = vrot.lane.b32.xlu2 %v650_v32, %s1490_s2 }
 0x140   :  { %1335 = vrot.lane.b32.xlu2 %v1176_v44, %s1491_s18 }
 0x148   :  { %694 = vrot.lane.b32.xlu2 %v689_v25, %s1490_s2 }
 0x162   :  { %v658_v2 = vpop.permute.xlu2 %657  ;;  %v1346_v56 = vpop.permute.xlu0 %1345 }
 0x163   :  { %v663_v24 = vmul.f32 %v658_v2, %v2105_v57  ;;  %v1351_v58 = vmul.f32 %v1346_v56, %v2105_v57 }
 0x165   :  { %667 = vrot.lane.b32.xlu0 %v663_v24, %s1492_s23  ;;  %1355 = vrot.lane.b32.xlu2 %v1351_v58, %s1492_s23 }
 0x182   :  { %v660_v51 = vpop.permute.xlu2 %659 }
 0x183   :  { %v664_v14 = vmul.f32 %v660_v51, %v652_v60 }
 0x185   :  { %669 = vrot.lane.b32.xlu1 %v664_v14, %s1492_s23 }
 0x187   :  { %v1348_v30 = vpop.permute.xlu1 %1347  ;;  %v1377_v15 = vpop.permute.xlu0 %1376 }
 0x188   :  { %v1352_v61 = vmul.f32 %v1348_v30, %v652_v60  ;;  %v1381_v12 = vmul.f32 %v1377_v15, %v652_v60 }
 0x18a   :  { %v1375_v18 = vpop.permute.xlu2 %1374  ;;  %1386 = vrot.lane.b32.xlu2 %v1381_v12, %s1490_s2  ;;  %1357 = vrot.lane.b32.xlu0 %v1352_v61, %s1492_s23 }
 0x18b   :  { %v1380_v48 = vmul.f32 %v1375_v18, %v2105_v57 }
 0x18d   :  { %1384 = vrot.lane.b32.xlu1 %v1380_v48, %s1490_s2 }
 0x18f   :  { %v681_v45 = vpop.permute.xlu1 %680  ;;  %v1338_v33 = vpop.permute.xlu0 %1337 }
 0x190   :  { %v686_v6 = vmul.f32 %v681_v45, %v2105_v57  ;;  %v1342_v63 = vmul.f32 %v1338_v33, %v652_v60 }
 0x192   :  { %v683_v59 = vpop.permute.xlu2 %682 }
 0x193   :  { %v687_v3 = vmul.f32 %v683_v59, %v652_v60 }
 0x197   :  { %v1369_v37 = vpop.permute.xlu1 %1368  ;;  %v1367_v49 = vpop.permute.xlu0 %1366 }
 0x198   :  { %v1373_v42 = vmul.f32 %v1369_v37, %v652_v60  ;;  %v1372_v27 = vmul.f32 %v1367_v49, %v2105_v57 }
 0x19a   :  { %v1336_v21 = vpop.permute.xlu2 %1335 }
 0x19b   :  { %v1341_v39 = vmul.f32 %v1336_v21, %v2105_v57 }
 0x19f   :  { %v693_v62 = vpop.permute.xlu1 %692 }
 0x1a0   :  { %v698_v35 = vadd.f32 %v693_v62, %v686_v6 }
 0x1a2   :  { %v695_v29 = vpop.permute.xlu2 %694 }
 0x1a3   :  { %v699_v26 = vadd.f32 %v695_v29, %v687_v3 }
 0x1bf   :  { %v1356_v40 = vpop.permute.xlu2 %1355 }
 0x1c0   :  { %v1361_v36 = vsub.f32 %v1341_v39, %v1356_v40 }
 0x1d7   :  { %v668_v4 = vpop.permute.xlu0 %667 }
 0x1d8   :  { %v673_v17 = vsub.f32 %v653_v31, %v668_v4 }
 0x1da   :  { %676 = vst.msk [vmem:[#allocation2] sm:$0xff] %vm675_vm8, %v673_v17 }
 0x1db   :  { %701 = vst.msk [vmem:[#allocation2] sm:$0xff] %vm700_vm9, %v698_v35 }
 0x1dc   :  { %1364 = vst.msk [vmem:[#allocation2] sm:$0xff] %vm1363_vm10, %v1361_v36 }
 0x1e4   :  { %v1387_v28 = vpop.permute.xlu2 %1386 }
 0x1e5   :  { %v1391_v16 = vadd.f32 %v1387_v28, %v1373_v42 }
 0x1f7   :  { %v670_v19 = vpop.permute.xlu1 %669 }
 0x1f8   :  { %v674_v53 = vsub.f32 %v654_v22, %v670_v19 }
 0x1fa   :  { %677 = vst.msk [vmem:[#allocation2 + $0x8] sm:$0xff] %vm675_vm8, %v674_v53 }
 0x1fb   :  { %702 = vst.msk [vmem:[#allocation2 + $0x8] sm:$0xff] %vm700_vm9, %v699_v26 }
 0x1fc   :  { %v1358_v13 = vpop.permute.xlu0 %1357 }
 0x1fd   :  { %v1362_v43 = vsub.f32 %v1342_v63, %v1358_v13 }
 0x1ff   :  { %v1385_v10 = vpop.permute.xlu1 %1384  ;;  %1365 = vst.msk [vmem:[#allocation2 + $0x8] sm:$0xff] %vm1363_vm10, %v1362_v43 }
 0x200   :  { %v1390_v54 = vadd.f32 %v1385_v10, %v1372_v27  ;;  %1394 = vst.msk [vmem:[#allocation2 + $0x8] sm:$0xff] %vm1392_vm11, %v1391_v16 }
 0x202   :  { %1393 = vst.msk [vmem:[#allocation2] sm:$0xff] %vm1392_vm11, %v1390_v54 }
 0x203   :  { %1407 = dma.vmem_to_hbm [thread:$0]  %s1400_s27, 256, %s1402_s25, [#allocation3], %s1494_s28, %s1494_s28, %s1490_s2  }
 0x204   :  { %1479 = dma.done.wait [#allocation3], 256  }
 0x205   :  { %1480 = vsyncadd [#allocation3], 4294967040 }
 0x206   :  { %1412 = vsyncpa [#allocation3], 1 }

</bundles_post_ra>
